<compile_context>
chip_gen: v7x
topology: tpu7x:2x2x1
jax: 0.10.0
libtpu: 0.0.40
codegen_flags: <defaults>
</compile_context>

<pallas_src>
import functools
import numpy as np
import jax
import jax.numpy as jnp
from jax.experimental import pallas as pl
from jax.experimental.pallas import tpu as pltpu


def _round_up(x, m):
    return (x + m - 1) // m * m


# ---------------------------------------------------------------------------
# Pallas kernel 1: tiled matmul + per-output-channel affine (folded BN) + ReLU
#   bf16 (or f32) operands, f32 scratch accumulator, bf16 (or f32) output blocks
# ---------------------------------------------------------------------------
def _mm_affine_kernel(x_ref, w_ref, s_ref, b_ref, o_ref, acc_ref, *, relu):
    k = pl.program_id(2)
    nk = pl.num_programs(2)
    prod = jnp.dot(x_ref[...], w_ref[...], preferred_element_type=jnp.float32)

    @pl.when(k == 0)
    def _():                       # first k-step writes (no zero-init pass)
        acc_ref[...] = prod

    @pl.when(k > 0)
    def _():
        acc_ref[...] += prod

    @pl.when(k == nk - 1)
    def _():
        y = acc_ref[...] * s_ref[...] + b_ref[...]
        if relu:
            y = jnp.maximum(y, 0.0)
        o_ref[...] = y.astype(o_ref.dtype)


def _pick_tile(dp, cands):
    for t in cands:
        if dp % t == 0:
            return t
    return 128


def _pick_tm(M):
    if M >= 4096:
        return 512
    if M >= 1024:
        return 256
    if M >= 256:
        return 128
    return _round_up(M, 8)


def _mm_tiles(M, Kp, Np):
    TM = _pick_tm(M)
    TK = _pick_tile(Kp, (512, 384, 256, 128))
    # v6e/v7x MXUs are 256 wide: prefer 512/256 output tiles over 384.
    TN = _pick_tile(Np, (512, 256, 384, 128))
    # v7x megacore: make sure the parallel (i, j) portion of the grid has work for
    # both TensorCores.
    for _ in range(3):
        if pl.cdiv(M, TM) * (Np // TN) >= 4:
            break
        if TN > 128:
            TN = TN // 2 if ((TN // 2) % 128 == 0 and Np % (TN // 2) == 0) else 128
        elif TM > 128:
            TM //= 2
        else:
            break
    return TM, TK, TN


@functools.lru_cache(maxsize=None)
def _mm_callable(M, Kp, Np, TM, TK, TN, relu, in_dtype_name, out_dtype_name):
    in_bytes = jnp.dtype(in_dtype_name).itemsize
    out_dtype = jnp.dtype(out_dtype_name)
    grid = (pl.cdiv(M, TM), Np // TN, Kp // TK)
    # shape-derived VMEM budget: double-buffered inputs/outputs + f32 accumulator
    vmem = (2 * (TM * TK + TK * TN) * in_bytes + TM * TN * 4
            + 2 * TM * TN * out_dtype.itemsize + 16 * TN)
    vmem_limit = int(min(56 * 2**20, max(32 * 2**20, 2 * vmem)))
    f = pl.pallas_call(
        functools.partial(_mm_affine_kernel, relu=relu),
        out_shape=jax.ShapeDtypeStruct((M, Np), out_dtype),
        grid_spec=pltpu.PrefetchScalarGridSpec(
            num_scalar_prefetch=0,
            grid=grid,
            in_specs=[
                pl.BlockSpec((TM, TK), lambda i, j, k: (i, k)),
                pl.BlockSpec((TK, TN), lambda i, j, k: (k, j)),
                pl.BlockSpec((1, TN), lambda i, j, k: (0, j)),
                pl.BlockSpec((1, TN), lambda i, j, k: (0, j)),
            ],
            out_specs=pl.BlockSpec((TM, TN), lambda i, j, k: (i, j)),
            scratch_shapes=[pltpu.VMEM((TM, TN), jnp.float32)],
        ),
        compiler_params=pltpu.CompilerParams(
            dimension_semantics=("parallel", "parallel", "arbitrary"),
            vmem_limit_bytes=vmem_limit),
    )
    return jax.jit(f)


def _mm(x, wp, sp, bp, relu, out_dtype):
    """x:(M,Kp) with Kp%128==0 (M ragged), wp:(Kp,Np), sp/bp:(1,Np) -> (M,Np)."""
    M, Kp = x.shape
    Kw, Np = wp.shape
    assert Kp == Kw and Kp % 128 == 0 and Np % 128 == 0
    TM, TK, TN = _mm_tiles(M, Kp, Np)
    fn = _mm_callable(M, Kp, Np, TM, TK, TN, bool(relu), str(x.dtype),
                      jnp.dtype(out_dtype).name)
    return fn(x, wp, sp, bp)


def matmul_affine(a, b, scale, shift, relu, dtype=jnp.float32,
                  out_dtype=jnp.float32):
    """act((a @ b) * scale + shift); a:(M,K) b:(K,N) scale/shift:(N,)."""
    M, K = a.shape
    K2, N = b.shape
    assert K == K2
    Kp, Np = _round_up(K, 128), _round_up(N, 128)
    ap = a.astype(dtype)
    if Kp != K:
        ap = jnp.pad(ap, ((0, 0), (0, Kp - K)))
    bw = jnp.pad(b.astype(dtype), ((0, Kp - K), (0, Np - N)))
    sp = jnp.pad(scale.astype(jnp.float32), (0, Np - N)).reshape(1, Np)
    sh = jnp.pad(shift.astype(jnp.float32), (0, Np - N)).reshape(1, Np)
    y = _mm(ap, bw, sp, sh, relu, out_dtype)
    return y[:, :N] if Np != N else y


def matmul_affine_prepadded(x2d, wp, sp, bp, cout, relu):
    """Conv path: weights already bf16 + padded to (Kp, Np); x2d already K-padded."""
    y = _mm(x2d, wp, sp, bp, relu, jnp.bfloat16)
    Np = wp.shape[1]
    return y[:, :cout] if Np != cout else y


# ---------------------------------------------------------------------------
# Pallas kernel 2: separable 3x3 stride-1 pooling on (image, row-strip) slabs
#   2-row halo fetched via two extra 1-row BlockSpecs on the same array
# ---------------------------------------------------------------------------
def _pool3_kernel(xm_ref, h1_ref, h2_ref, o_ref, *, op):
    tr = o_ref.shape[1]
    wo = o_ref.shape[2]
    v = jnp.concatenate([xm_ref[0], h1_ref[0], h2_ref[0]], axis=0)  # (tr+2, Wp, C)
    if op == "avg":                                   # count_include_pad=True
        v = v.astype(jnp.float32)
        r = v[:, 0:wo, :] + v[:, 1:wo + 1, :] + v[:, 2:wo + 2, :]
        t = (r[0:tr] + r[1:tr + 1] + r[2:tr + 2]) * (1.0 / 9.0)
    else:                                             # max (exact in bf16)
        r = jnp.maximum(jnp.maximum(v[:, 0:wo, :], v[:, 1:wo + 1, :]),
                        v[:, 2:wo + 2, :])
        t = jnp.maximum(jnp.maximum(r[0:tr], r[1:tr + 1]), r[2:tr + 2])
    o_ref[0] = t.astype(o_ref.dtype)


def _pick_strip(Ho, cap=40):
    """Largest divisor of Ho that is <= cap (whole image if Ho already small)."""
    if Ho <= cap:
        return Ho
    for t in range(cap, 7, -1):
        if Ho % t == 0:
            return t
    return Ho


@functools.lru_cache(maxsize=None)
def _pool3_callable(N, Hp, Wp, C, TRo, op):
    Ho, Wo = Hp - 2, Wp - 2
    row = _round_up(Wp, 8) * _round_up(C, 128)
    vmem_limit = int(min(56 * 2**20, max(16 * 2**20, 6 * (TRo + 2) * row * 4)))
    f = pl.pallas_call(
        functools.partial(_pool3_kernel, op=op),
        out_shape=jax.ShapeDtypeStruct((N, Ho, Wo, C), jnp.bfloat16),
        grid=(N, Ho // TRo),
        in_specs=[
            pl.BlockSpec((1, TRo, Wp, C), lambda n, s: (n, s, 0, 0)),
            pl.BlockSpec((1, 1, Wp, C), lambda n, s: (n, (s + 1) * TRo, 0, 0)),
            pl.BlockSpec((1, 1, Wp, C), lambda n, s: (n, (s + 1) * TRo + 1, 0, 0)),
        ],
        out_specs=pl.BlockSpec((1, TRo, Wo, C), lambda n, s: (n, s, 0, 0)),
        compiler_params=pltpu.CompilerParams(
            dimension_semantics=("parallel", "arbitrary"),
            vmem_limit_bytes=vmem_limit),
    )
    return jax.jit(f)


def pool2d(x, op, ksize=3, stride=2, pad=0):
    """nn.MaxPool2d(3,2) / F.avg_pool2d(3,1,1,count_include_pad=True) on NHWC."""
    assert ksize == 3
    N, H, W, C = x.shape
    xb = x.astype(jnp.bfloat16)        # exact for max; avg accumulates f32 in-kernel
    xp = jnp.pad(xb, ((0, 0), (pad, pad), (pad, pad), (0, 0))) if pad else xb
    Hp, Wp = H + 2 * pad, W + 2 * pad
    TRo = _pick_strip(Hp - 2)
    full = _pool3_callable(N, Hp, Wp, C, TRo, op)(xp, xp, xp)   # stride-1 3x3 result
    if stride == 1:
        return full
    # TODO(synk): fold the stride-2 subsample into the pool kernel (strided slab
    # slices) to avoid this half-resolution intermediate for the 4 stride-2 maxpools.
    return full[:, ::stride, ::stride, :]


# ---------------------------------------------------------------------------
# Pallas kernel 3: AdaptiveAvgPool2d((1,1)) = global spatial mean (bf16 in, f32 out)
# ---------------------------------------------------------------------------
def _gap_kernel(x_ref, o_ref, *, inv):
    o_ref[...] = jnp.sum(x_ref[...].astype(jnp.float32), axis=1) * inv


@functools.lru_cache(maxsize=None)
def _gap_callable(N, HWp, Cp, inv, in_dtype_name):
    del in_dtype_name
    f = pl.pallas_call(
        functools.partial(_gap_kernel, inv=inv),
        out_shape=jax.ShapeDtypeStruct((N, Cp), jnp.float32),
        grid=(1,),
        in_specs=[pl.BlockSpec((N, HWp, Cp), lambda i: (0, 0, 0))],
        out_specs=pl.BlockSpec((N, Cp), lambda i: (0, 0)),
    )
    return jax.jit(f)


def global_avg_pool(x):
    N, H, W, C = x.shape
    HW = H * W
    HWp, Cp = _round_up(HW, 8), _round_up(C, 128)
    xr = x.reshape(N, HW, C)
    if (HWp, Cp) != (HW, C):
        xr = jnp.pad(xr, ((0, 0), (0, HWp - HW), (0, Cp - C)))
    out = _gap_callable(N, HWp, Cp, 1.0 / HW, str(xr.dtype))(xr)
    return out[:, :C].reshape(N, 1, 1, C)


# ---------------------------------------------------------------------------
# Conv (bf16 im2col glue + Pallas matmul) and parameter construction
# ---------------------------------------------------------------------------
_KEY = jax.random.PRNGKey(0)
_LAYER = [0]


def extract_patches(x, kh, kw, stride, padding, kp):
    """im2col NHWC -> (N,Ho,Wo,kp); K padding folded into the same concatenate."""
    N, H, W, C = x.shape
    sh, sw = stride
    ph, pw = padding
    xp = jnp.pad(x, ((0, 0), (ph, ph), (pw, pw), (0, 0))) if (ph or pw) else x
    Ho = (H + 2 * ph - kh) // sh + 1
    Wo = (W + 2 * pw - kw) // sw + 1
    cols = []
    for i in range(kh):
        for j in range(kw):
            cols.append(xp[:, i:i + sh * (Ho - 1) + 1:sh,
                           j:j + sw * (Wo - 1) + 1:sw, :])
    K = kh * kw * C
    if kp > K:
        cols.append(jnp.zeros((N, Ho, Wo, kp - K), x.dtype))
    return jnp.concatenate(cols, axis=-1), Ho, Wo


def conv_params(cin, cout, kh, kw, stride=(1, 1), padding=(0, 0)):
    """BasicConv2d = Conv2d(bias=False)+BatchNorm2d(eps=1e-3, eval)+ReLU.
    Deterministic synthetic weights; BN folded to scale/shift; weights pre-cast to
    bf16 and pre-padded to (Kp, Np) once at build time."""
    _LAYER[0] += 1
    k = jax.random.fold_in(_KEY, _LAYER[0])
    w = jax.random.normal(k, (kh, kw, cin, cout), jnp.float32) * np.float32(
        np.sqrt(2.0 / (kh * kw * cin)))
    gamma = jnp.ones((cout,), jnp.float32)
    beta = jnp.zeros((cout,), jnp.float32)
    mean = jnp.zeros((cout,), jnp.float32)
    var = jnp.ones((cout,), jnp.float32)
    scale = gamma / jnp.sqrt(var + 1e-3)
    shift = beta - mean * scale

    K = kh * kw * cin
    Kp, Np = _round_up(K, 128), _round_up(cout, 128)
    wp = jnp.pad(w.reshape(K, cout).astype(jnp.bfloat16),
                 ((0, Kp - K), (0, Np - cout)))
    sp = jnp.pad(scale, (0, Np - cout)).reshape(1, Np)
    bp = jnp.pad(shift, (0, Np - cout)).reshape(1, Np)
    return dict(wp=wp, sp=sp, bp=bp, K=K, cout=cout, kh=kh, kw=kw, cin=cin,
                stride=stride, padding=padding)


def fused_conv1x1_params(cin, couts):
    """Several parallel 1x1 BasicConv2d on the same input fused into one matmul."""
    p = conv_params(cin, sum(couts), 1, 1)
    p["splits"] = tuple(couts)
    return p


def basic_conv(x, p):
    kh, kw = p["kh"], p["kw"]
    N = x.shape[0]
    xb = x.astype(jnp.bfloat16)
    Kp = p["wp"].shape[0]
    if kh == 1 and kw == 1 and p["stride"] == (1, 1) and p["padding"] == (0, 0):
        Ho, Wo = x.shape[1], x.shape[2]
        x2 = xb.reshape(N * Ho * Wo, p["cin"])
        if Kp != p["cin"]:
            x2 = jnp.pad(x2, ((0, 0), (0, Kp - p["cin"])))
    else:
        # TODO(synk): replace im2col with a tap-decomposed direct conv (grid over
        # kh*kw taps reading shifted activation windows) to kill this patch tensor.
        pats, Ho, Wo = extract_patches(xb, kh, kw, p["stride"], p["padding"], Kp)
        x2 = pats.reshape(N * Ho * Wo, Kp)
    y = matmul_affine_prepadded(x2, p["wp"], p["sp"], p["bp"], p["cout"], relu=True)
    return y.reshape(N, Ho, Wo, p["cout"])


def fused_basic_conv1x1(x, p):
    y = basic_conv(x, p)
    outs, o = [], 0
    for c in p["splits"]:
        outs.append(y[..., o:o + c])
        o += c
    return outs


# ----------------------- Inception blocks (torchvision) --------------------
def inception_a_params(cin, pool_features):
    return dict(f1=fused_conv1x1_params(cin, (64, 48, 64)),   # b1x1, b5x5_1, bd_1
                b5x5_2=conv_params(48, 64, 5, 5, padding=(2, 2)),
                bd_2=conv_params(64, 96, 3, 3, padding=(1, 1)),
                bd_3=conv_params(96, 96, 3, 3, padding=(1, 1)),
                bpool=conv_params(cin, pool_features, 1, 1))


def inception_a(x, p):
    b1, b5, bd = fused_basic_conv1x1(x, p["f1"])
    b5 = basic_conv(b5, p["b5x5_2"])
    bd = basic_conv(basic_conv(bd, p["bd_2"]), p["bd_3"])
    bp = basic_conv(pool2d(x, "avg", 3, 1, 1), p["bpool"])
    return jnp.concatenate([b1, b5, bd, bp], axis=-1)


def inception_b_params(cin):
    return dict(b3x3=conv_params(cin, 384, 3, 3, stride=(2, 2)),
                bd_1=conv_params(cin, 64, 1, 1),
                bd_2=conv_params(64, 96, 3, 3, padding=(1, 1)),
                bd_3=conv_params(96, 96, 3, 3, stride=(2, 2)))


def inception_b(x, p):
    b3 = basic_conv(x, p["b3x3"])
    bd = basic_conv(basic_conv(basic_conv(x, p["bd_1"]), p["bd_2"]), p["bd_3"])
    bp = pool2d(x, "max", 3, 2, 0)
    return jnp.concatenate([b3, bd, bp], axis=-1)


def inception_c_params(cin, c7):
    return dict(f1=fused_conv1x1_params(cin, (192, c7, c7)),  # b1x1, b7_1, bd_1
                b7_2=conv_params(c7, c7, 1, 7, padding=(0, 3)),
                b7_3=conv_params(c7, 192, 7, 1, padding=(3, 0)),
                bd_2=conv_params(c7, c7, 7, 1, padding=(3, 0)),
                bd_3=conv_params(c7, c7, 1, 7, padding=(0, 3)),
                bd_4=conv_params(c7, c7, 7, 1, padding=(3, 0)),
                bd_5=conv_params(c7, 192, 1, 7, padding=(0, 3)),
                bpool=conv_params(cin, 192, 1, 1))


def inception_c(x, p):
    b1, b7, bd = fused_basic_conv1x1(x, p["f1"])
    b7 = basic_conv(basic_conv(b7, p["b7_2"]), p["b7_3"])
    for k in ("bd_2", "bd_3", "bd_4", "bd_5"):
        bd = basic_conv(bd, p[k])
    bp = basic_conv(pool2d(x, "avg", 3, 1, 1), p["bpool"])
    return jnp.concatenate([b1, b7, bd, bp], axis=-1)


def inception_d_params(cin):
    return dict(f1=fused_conv1x1_params(cin, (192, 192)),     # b3_1, b7_1
                b3_2=conv_params(192, 320, 3, 3, stride=(2, 2)),
                b7_2=conv_params(192, 192, 1, 7, padding=(0, 3)),
                b7_3=conv_params(192, 192, 7, 1, padding=(3, 0)),
                b7_4=conv_params(192, 192, 3, 3, stride=(2, 2)))


def inception_d(x, p):
    b3, b7 = fused_basic_conv1x1(x, p["f1"])
    b3 = basic_conv(b3, p["b3_2"])
    for k in ("b7_2", "b7_3", "b7_4"):
        b7 = basic_conv(b7, p[k])
    bp = pool2d(x, "max", 3, 2, 0)
    return jnp.concatenate([b3, b7, bp], axis=-1)


def inception_e_params(cin):
    return dict(f1=fused_conv1x1_params(cin, (320, 384, 448)),  # b1x1, b3_1, bd_1
                b3_2a=conv_params(384, 384, 1, 3, padding=(0, 1)),
                b3_2b=conv_params(384, 384, 3, 1, padding=(1, 0)),
                bd_2=conv_params(448, 384, 3, 3, padding=(1, 1)),
                bd_3a=conv_params(384, 384, 1, 3, padding=(0, 1)),
                bd_3b=conv_params(384, 384, 3, 1, padding=(1, 0)),
                bpool=conv_params(cin, 192, 1, 1))


def inception_e(x, p):
    b1, b3, bd = fused_basic_conv1x1(x, p["f1"])
    b3 = jnp.concatenate([basic_conv(b3, p["b3_2a"]),
                          basic_conv(b3, p["b3_2b"])], axis=-1)
    bd = basic_conv(bd, p["bd_2"])
    bd = jnp.concatenate([basic_conv(bd, p["bd_3a"]),
                          basic_conv(bd, p["bd_3b"])], axis=-1)
    bp = basic_conv(pool2d(x, "avg", 3, 1, 1), p["bpool"])
    return jnp.concatenate([b1, b3, bd, bp], axis=-1)


# ----------------------- bilinear resize (Pallas matmuls, f32) --------------
def _bilinear_matrix(in_size, out_size):
    # matches F.interpolate(mode='bilinear', align_corners=False)
    A = np.zeros((out_size, in_size), np.float32)
    scale = in_size / out_size
    for o in range(out_size):
        src = max((o + 0.5) * scale - 0.5, 0.0)
        i0 = min(int(np.floor(src)), in_size - 1)
        i1 = min(i0 + 1, in_size - 1)
        w1 = src - i0
        A[o, i0] += 1.0 - w1
        A[o, i1] += w1
    return jnp.asarray(A)


def resize_299_and_normalize(x, normalize):
    """NHWC -> (N,299,299,C); `2*x-1` fused into the second matmul epilogue."""
    N, H, W, C = x.shape
    Ah, Aw = _bilinear_matrix(H, 299), _bilinear_matrix(W, 299)
    xh = jnp.transpose(x, (1, 0, 2, 3)).reshape(H, N * W * C)          # rows = H
    ones = jnp.ones((N * W * C,), jnp.float32)
    y = matmul_affine(Ah, xh, ones, jnp.zeros_like(ones), relu=False)
    y = y.reshape(299, N, W, C)
    yw = jnp.transpose(y, (2, 1, 0, 3)).reshape(W, N * 299 * C)        # rows = W
    cols = N * 299 * C
    s = jnp.full((cols,), 2.0 if normalize else 1.0, jnp.float32)
    b = jnp.full((cols,), -1.0 if normalize else 0.0, jnp.float32)
    z = matmul_affine(Aw, yw, s, b, relu=False).reshape(299, N, 299, C)
    return jnp.transpose(z, (1, 2, 0, 3))                              # N,299,299,C


# ----------------------- full model ----------------------------------------
def build_params():
    P = {}
    P["Conv2d_1a_3x3"] = conv_params(3, 32, 3, 3, stride=(2, 2))
    P["Conv2d_2a_3x3"] = conv_params(32, 32, 3, 3)
    P["Conv2d_2b_3x3"] = conv_params(32, 64, 3, 3, padding=(1, 1))
    P["Conv2d_3b_1x1"] = conv_params(64, 80, 1, 1)
    P["Conv2d_4a_3x3"] = conv_params(80, 192, 3, 3)
    P["Mixed_5b"] = inception_a_params(192, 32)
    P["Mixed_5c"] = inception_a_params(256, 64)
    P["Mixed_5d"] = inception_a_params(288, 64)
    P["Mixed_6a"] = inception_b_params(288)
    P["Mixed_6b"] = inception_c_params(768, 128)
    P["Mixed_6c"] = inception_c_params(768, 160)
    P["Mixed_6d"] = inception_c_params(768, 160)
    P["Mixed_6e"] = inception_c_params(768, 192)
    P["Mixed_7a"] = inception_d_params(768)
    P["Mixed_7b"] = inception_e_params(1280)
    P["Mixed_7c"] = inception_e_params(2048)
    return P


def inception_v3_forward(x_nchw, P, output_blocks=(3,),
                         resize_input=True, normalize_input=True):
    output_blocks = sorted(output_blocks)
    last = max(output_blocks)
    outp = []
    x = jnp.transpose(x_nchw.astype(jnp.float32), (0, 2, 3, 1))   # NCHW -> NHWC
    if resize_input:
        x = resize_299_and_normalize(x, normalize_input)
    elif normalize_input:
        x = 2.0 * x - 1.0   # non-default path; trivial elementwise glue

    def block0(x):
        x = basic_conv(x, P["Conv2d_1a_3x3"])
        x = basic_conv(x, P["Conv2d_2a_3x3"])
        x = basic_conv(x, P["Conv2d_2b_3x3"])
        return pool2d(x, "max", 3, 2, 0)

    def block1(x):
        x = basic_conv(x, P["Conv2d_3b_1x1"])
        x = basic_conv(x, P["Conv2d_4a_3x3"])
        return pool2d(x, "max", 3, 2, 0)

    def block2(x):
        x = inception_a(x, P["Mixed_5b"])
        x = inception_a(x, P["Mixed_5c"])
        x = inception_a(x, P["Mixed_5d"])
        x = inception_b(x, P["Mixed_6a"])
        x = inception_c(x, P["Mixed_6b"])
        x = inception_c(x, P["Mixed_6c"])
        x = inception_c(x, P["Mixed_6d"])
        return inception_c(x, P["Mixed_6e"])

    def block3(x):
        x = inception_d(x, P["Mixed_7a"])
        x = inception_e(x, P["Mixed_7b"])
        x = inception_e(x, P["Mixed_7c"])
        return global_avg_pool(x)

    for idx, blk in enumerate((block0, block1, block2, block3)):
        x = blk(x)
        if idx in output_blocks:
            outp.append(jnp.transpose(x.astype(jnp.float32), (0, 3, 1, 2)))
        if idx == last:
            break
    return outp


if __name__ == "__main__":
    key = jax.random.PRNGKey(0)
    # small image batch, NCHW like PyTorch (forward resizes to 299x299 internally)
    x = jax.random.uniform(key, (2, 3, 16, 16), dtype=jnp.float32)
    params = build_params()
    outs = inception_v3_forward(x, params)           # default output_blocks=[3]
    feat = jax.block_until_ready(outs[-1])
    assert feat.shape == (2, 2048, 1, 1), feat.shape
    assert bool(jnp.all(jnp.isfinite(feat)))
    print("KERNEL_OK")
</pallas_src>

<mosaic_0001>
module attributes {stable_mosaic.version = 11 : i64} {
  func.func @_mm_affine_kernel(%arg0: i32, %arg1: i32, %arg2: i32, %arg3: memref<128x128xf32, #tpu.memory_space<vmem>>, %arg4: memref<128x128xf32, #tpu.memory_space<vmem>>, %arg5: memref<1x128xf32, #tpu.memory_space<vmem>>, %arg6: memref<1x128xf32, #tpu.memory_space<vmem>>, %arg7: memref<128x128xf32, #tpu.memory_space<vmem>>, %arg8: memref<128x128xf32, #tpu.memory_space<vmem>>) attributes {dimension_semantics = [#tpu.dimension_semantics<parallel>, #tpu.dimension_semantics<parallel>, #tpu.dimension_semantics<arbitrary>], iteration_bounds = array<i64: 3, 1, 1>, scalar_prefetch = 0 : i64, scratch_operands = 1 : i64, tpu.core_type = #tpu.core_type<tc>, window_params = [{transform_indices = @transform_0, window_bounds = array<i64: 128, 128>}, {transform_indices = @transform_1, window_bounds = array<i64: 128, 128>}, {transform_indices = @transform_2, window_bounds = array<i64: 1, 128>}, {transform_indices = @transform_3, window_bounds = array<i64: 1, 128>}, {transform_indices = @transform_4, window_bounds = array<i64: 128, 128>}]} {
    %c0 = arith.constant 0 : index
    %c0_0 = arith.constant 0 : index
    %0 = vector.load %arg3[%c0, %c0_0] : memref<128x128xf32, #tpu.memory_space<vmem>>, vector<128x128xf32>
    %c0_1 = arith.constant 0 : index
    %c0_2 = arith.constant 0 : index
    %1 = vector.load %arg4[%c0_1, %c0_2] : memref<128x128xf32, #tpu.memory_space<vmem>>, vector<128x128xf32>
    %cst = arith.constant dense<0.000000e+00> : vector<128x128xf32>
    %2 = tpu.matmul %0, %1, %cst {dimension_numbers = #tpu.dot_dimension_numbers<[1], [0], [0], [1], [0, 0, 1, 1], [], []>} : vector<128x128xf32>, vector<128x128xf32>, vector<128x128xf32> -> vector<128x128xf32>
    %c0_i32 = arith.constant 0 : i32
    %3 = arith.cmpi eq, %arg2, %c0_i32 : i32
    %4 = arith.extui %3 : i1 to i32
    %c0_i32_3 = arith.constant 0 : i32
    %5 = arith.cmpi ne, %4, %c0_i32_3 : i32
    scf.if %5 {
      %c0_8 = arith.constant 0 : index
      %c0_9 = arith.constant 0 : index
      %12 = vector.load %arg8[%c0_8, %c0_9] : memref<128x128xf32, #tpu.memory_space<vmem>>, vector<128x128xf32>
      tpu.vector_store %arg8[%c0_8, %c0_9], %2 {strides = array<i32>} : memref<128x128xf32, #tpu.memory_space<vmem>>, vector<128x128xf32>,
    } else {
    }
    %c0_i32_4 = arith.constant 0 : i32
    %6 = arith.cmpi sgt, %arg2, %c0_i32_4 : i32
    %7 = arith.extui %6 : i1 to i32
    %c0_i32_5 = arith.constant 0 : i32
    %8 = arith.cmpi ne, %7, %c0_i32_5 : i32
    scf.if %8 {
      %c0_8 = arith.constant 0 : index
      %c0_9 = arith.constant 0 : index
      %12 = vector.load %arg8[%c0_8, %c0_9] : memref<128x128xf32, #tpu.memory_space<vmem>>, vector<128x128xf32>
      %13 = arith.addf %12, %2 : vector<128x128xf32>
      %c0_10 = arith.constant 0 : index
      %c0_11 = arith.constant 0 : index
      %14 = vector.load %arg8[%c0_10, %c0_11] : memref<128x128xf32, #tpu.memory_space<vmem>>, vector<128x128xf32>
      tpu.vector_store %arg8[%c0_10, %c0_11], %13 {strides = array<i32>} : memref<128x128xf32, #tpu.memory_space<vmem>>, vector<128x128xf32>,
    } else {
    }
    %c0_i32_6 = arith.constant 0 : i32
    %9 = arith.cmpi eq, %arg2, %c0_i32_6 : i32
    %10 = arith.extui %9 : i1 to i32
    %c0_i32_7 = arith.constant 0 : i32
    %11 = arith.cmpi ne, %10, %c0_i32_7 : i32
    scf.if %11 {
      %c0_8 = arith.constant 0 : index
      %c0_9 = arith.constant 0 : index
      %12 = vector.load %arg8[%c0_8, %c0_9] : memref<128x128xf32, #tpu.memory_space<vmem>>, vector<128x128xf32>
      %c0_10 = arith.constant 0 : index
      %c0_11 = arith.constant 0 : index
      %13 = vector.load %arg5[%c0_10, %c0_11] : memref<1x128xf32, #tpu.memory_space<vmem>>, vector<1x128xf32>
      %14 = vector.broadcast %13 : vector<1x128xf32> to vector<128x128xf32>
      %15 = arith.mulf %12, %14 : vector<128x128xf32>
      %c0_12 = arith.constant 0 : index
      %c0_13 = arith.constant 0 : index
      %16 = vector.load %arg6[%c0_12, %c0_13] : memref<1x128xf32, #tpu.memory_space<vmem>>, vector<1x128xf32>
      %17 = vector.broadcast %16 : vector<1x128xf32> to vector<128x128xf32>
      %18 = arith.addf %15, %17 : vector<128x128xf32>
      %c0_14 = arith.constant 0 : index
      %c0_15 = arith.constant 0 : index
      %19 = vector.load %arg7[%c0_14, %c0_15] : memref<128x128xf32, #tpu.memory_space<vmem>>, vector<128x128xf32>
      tpu.vector_store %arg7[%c0_14, %c0_15], %18 {strides = array<i32>} : memref<128x128xf32, #tpu.memory_space<vmem>>, vector<128x128xf32>,
    } else {
    }
    return
  }
  func.func @transform_0(%arg0: i32, %arg1: i32, %arg2: i32) -> (i32, i32) {
    %c0_i32 = arith.constant 0 : i32
    return %arg0, %arg2 : i32, i32
  }
  func.func @transform_1(%arg0: i32, %arg1: i32, %arg2: i32) -> (i32, i32) {
    %c0_i32 = arith.constant 0 : i32
    return %arg2, %arg1 : i32, i32
  }
  func.func @transform_2(%arg0: i32, %arg1: i32, %arg2: i32) -> (i32, i32) {
    %c0_i32 = arith.constant 0 : i32
    %c0_i32_0 = arith.constant 0 : i32
    return %c0_i32, %arg1 : i32, i32
  }
  func.func @transform_3(%arg0: i32, %arg1: i32, %arg2: i32) -> (i32, i32) {
    %c0_i32 = arith.constant 0 : i32
    %c0_i32_0 = arith.constant 0 : i32
    return %c0_i32, %arg1 : i32, i32
  }
  func.func @transform_4(%arg0: i32, %arg1: i32, %arg2: i32) -> (i32, i32) {
    %c0_i32 = arith.constant 0 : i32
    return %arg0, %arg1 : i32, i32
  }
}

</mosaic_0001>

<bundles_post_ra>
// kernel: tpu_custom_call.1
= control target key start
LH: loop header
LB: loop body
LE: loop exit
PB: predicated region body
PF: predicated region fallthrough
CT: control target
= control target key end

     0   :  { %9 = vsyncpa [#allocation4], 0  ;;  %s1476_s0 = inlined_call_operand.hbm [shape: f32[299,128], index: 0, kind: input, shape index: {}]   ;;  %s1477_s1 = inlined_call_operand.hbm [shape: f32[128,128], index: 1, kind: input, shape index: {}]   ;;  %s1478_s2 = inlined_call_operand.vmem [shape: f32[1,128], index: 2, kind: input, shape index: {}]   ;;  %s1479_s3 = inlined_call_operand.vmem [shape: f32[1,128], index: 3, kind: input, shape index: {}]   ;;  %s1480_s4 = inlined_call_operand.hbm [shape: f32[299,128], index: 4, kind: output, shape index: {}]  }
   0x1   :  { %11 = vsyncpa [#allocation4 + $0x1], 0 }
   0x2   :  { %12 = vsyncpa [#allocation7], 0 }
   0x3   :  { %13 = vsyncpa [#allocation5], 0 }
   0x4   :  { %15 = vsyncpa [#allocation5 + $0x1], 0  ;;  %s1205_s15 = smov 0   ;;  %s1207_s16 = smov 0  }
   0x5   :  { %s1209_s17 = smov 0   ;;  %s1211_s18 = smov 0  }
   0x6   :  { %s1213_s19 = smov 0   ;;  %s1215_s20 = smov 0  }
   0x7 LB: > { %s788_s21 = sadd.s32 4294967295, %s1169_s20   ;;  %s789_s22 = sadd.s32 4294967294, %s1169_s20   ;;  %s1169_s20 = sphi %s1215_s20, %s21_s20   ;;  %s1165_s19 = sphi %s1213_s19, %s1502_s19   ;;  %s1161_s18 = sphi %s1211_s18, %s1501_s18   ;;  %s1157_s17 = sphi %s1209_s17, %s1500_s17   ;;  %s1153_s16 = sphi %s1207_s16, %s1499_s16   ;;  %s1149_s15 = sphi %s1205_s15, %s1498_s15  }
   0x8   : > { %s40_s23 = sadd.s32 1, %s1165_s19  ;;  %s49_s24 = sadd.s32 1, %s1157_s17 }
   0x9   : > { %p42_p0 = scmp.ge.s32.totalorder %s40_s23, 3  ;;  %p56_p1 = scmp.ne.s32.totalorder %s1157_s17, %s1153_s16 }
   0xa   : > { %p57_p2 = scmp.eq.s32.totalorder %s1169_s20, 0  ;;  %p62_p3 = scmp.ne.s32.totalorder %s1153_s16, %s1149_s15 }
   0xb   : > { %s1504_s23 = smov (%p42_p0, %s40_s23), 0  ;;  %p1250_p5 = scmp.eq.s32.totalorder %s788_s21, 0 }
   0xc   : > { %p1246_p4 = por %p57_p2, %p56_p1  ;;  %s44_s27 = ssub.s32 %s1165_s19, %s1504_s23 }
   0xd   : > { %s1486_s26 = scalar_select %p1250_p5, 1, 0 }
   0xe   : > { %s1485_s25 = scalar_select %p1246_p4, 1, 0 }
   0xf   : > { %p168_p6 = scmp.eq.s32.totalorder %s788_s21, 2  ;;  %p47_p7 = scmp.eq.s32.totalorder %s44_s27, 0 }
  0x10   : > { %p1258_p8 = por %p1250_p5, %p62_p3  ;;  %p174_p10 = scmp.eq.s32.totalorder %s789_s22, 2 }
  0x11   : > { %p1262_p9 = por %p168_p6, %p56_p1  ;;  %p790_p12 = scmp.ge.s32.totalorder %s1169_s20, 1 }
  0x12   : > { %s1487_s28 = scalar_select %p1258_p8, 1, 0 }
  0x13   : > { %s1488_s29 = scalar_select %p1262_p9, 1, 0 }
  0x14   : > { %s1267_s30 = scalar_select %p47_p7, %s1157_s17, %s49_s24  }
  0x15   : > { %p1269_p11 = por %p174_p10, %p62_p3  ;;  %p181_p13 = scmp.lt.s32.totalorder %s1169_s20, 4 }
  0x16   : > { %s1171_s7 = smov [#allocation6]   ;;  %s1027_s12 = scalar_lea.hbm %s1477_s1, 2048 }
  0x17   : > { %s1489_s5 = scalar_select %p1269_p11, 1, 0 }
  0x18   : > { %p1275_p0 = pnand %p790_p12, %p181_p13  ;;  %s197_s8 = sshll.u32 %s1171_s7, 4  ;;  %s198_s8 = int_to_ptr.vmem [resolvable:$true] %s197_s8 }
  0x19   : > { %p1028_p3 = scmp.ne.s32.totalorder %s1477_s1, %s1027_s12  ;;  %p1034_p12 = scmp.lt.u32.totalorder %s1027_s12, %s1477_s1 }
  0x1a   : > { %s1490_s6 = scalar_select %p1275_p0, 1, 0 }
  0x1b   : > { %p961_p1 = pneg %p1275_p0 }
  0x1d   : > { %p1283_p2 = pnand %p961_p1, %p1250_p5 }
  0x1f   : > { %p1029_p6 = pneg %p1283_p2 }
  0x21   : > { %p1030_p7 = pnand %p1029_p6, %p1028_p3 }
  0x23   : > { %p1031_p10 = pneg %p1030_p7 }
  0x25   : > { %p1036_p13 = pnand %p1034_p12, %p1031_p10 }
  0x27   : > { %1039 = shalt.err (!%p1036_p13)
}
  0x28   : > { %s1040_s24 = scalar_lea.vmem %s198_s8, 2048  ;;  %p1048_p5 = scmp.lt.s32.totalorder %s198_s8, %s198_s8 }
  0x29   : > { %p1041_p1 = scmp.ne.s32.totalorder %s198_s8, %s1040_s24  ;;  %p1049_p8 = scmp.lt.s32.totalorder %s1040_s24, %s1040_s24 }
  0x2b   : > { %p1043_p11 = pnand %p1041_p1, %p1029_p6  ;;  %p1050_p0 = por %p1049_p8, %p1048_p5 }
  0x2d   : > { %p1044_p9 = pneg %p1043_p11 }
  0x2f   : > { %p1051_p4 = pnand %p1050_p0, %p1044_p9 }
  0x31   : > { %1054 = shalt.err (!%p1051_p4)
}
  0x32   : > { %s1172_s27 = smov 128   ;;  %s1173_s7 = smov 8  }
  0x33   : > { %964 = dma.hbm_to_vmem [thread:$0]  (!%p1283_p2), %s1477_s1, 2048, %s198_s8, [#allocation7], %s1172_s27, %s1172_s27, %s1173_s7  }
  0x34   : > { %p794_p3 = scmp.ge.s32.totalorder %s1169_s20, 3 }
  0x35   : > { %p1492_p7 = scmp.ne.s32.totalorder (!%p794_p3), %s1485_s25, 0 }
  0x36   : > { %219 = sbr.rel (%p794_p3) target bundleno = 96 (0x60), region = 28 }
  0x3d   : > { %222 = sbr.rel (!%p1492_p7) target bundleno = 96 (0x60), region = 32  ;;  %s223_s12 = sand.u32 (%p1492_p7), 1, %s1157_s17  }
  0x3e   : > { %s796_s13 = sshll.u32 (%p1492_p7), %s1165_s19, 4  ;;  %s795_s14 = sshll.u32 (%p1492_p7), %s223_s12, 7 }
  0x3f   : > { %s229_s21 = ssub.s32 (%p1492_p7), 38, %s796_s13  ;;  %s1311_s24 = scalar_lea.sflag (%p1492_p7), [#allocation4], %s223_s12 }
  0x40   : > { %p230_p4 = scmp.lt.s32.totalorder (%p1492_p7), %s229_s21, 16  ;;  %s227_s8 = scalar_lea.vmem (%p1492_p7), [#allocation3], %s795_s14 }
  0x44   : > { %s1506_s21 = smov (!%p230_p4, %s229_s21), 16 }
  0x45   : > { %s1308_s22 = sshll.u32 %s1506_s21, 7 }
  0x46   : > { %s234_s9 = ssub.s32 2048, %s1308_s22 }
  0x47   : > { %235 = vsyncadd %s1311_s24, %s234_s9  ;;  %p798_p5 = scmp.ne.s32.totalorder %s1308_s22, 0  ;;  %s817_s25 = sshll.u32 %s1165_s19, 11 }
  0x48   : > { %s1319_s10 = scalar_lea.hbm %s1476_s0, %s817_s25  ;;  %s241_s11 = sshll.u32 %s227_s8, 4  ;;  %s1321_s11 = int_to_ptr.vmem [resolvable:$true] %s241_s11 }
  0x49   : > { %s1055_s12 = scalar_lea.hbm %s1319_s10, %s1308_s22  ;;  %s1059_s21 = scalar_lea.hbm %s1476_s0, 4864 }
  0x4a   : > { %p1056_p8 = scmp.ne.s32.totalorder %s1319_s10, %s1055_s12  ;;  %p1060_p0 = scmp.lt.u32.totalorder %s1319_s10, %s1476_s0 }
  0x4b   : > { %p1061_p2 = scmp.lt.u32.totalorder %s1059_s21, %s1055_s12  ;;  %p1063_p10 = scmp.lt.u32.totalorder %s1055_s12, %s1319_s10 }
  0x4c   : > { %p1057_p9 = pnand %p1056_p8, %p798_p5 }
  0x4d   : > { %p1062_p6 = por %p1061_p2, %p1060_p0 }
  0x4e   : > { %p1058_p11 = pneg %p1057_p9 }
  0x4f   : > { %p1064_p12 = por %p1063_p10, %p1062_p6 }
  0x51   : > { %p1065_p13 = pnand %p1064_p12, %p1058_p11 }
  0x53   : > { %1068 = shalt.err (!%p1065_p13)
}
  0x54   : > { %s1069_s8 = scalar_lea.vmem %s1321_s11, %s1308_s22  ;;  %s1174_s25 = smov [#allocation3]  }
  0x55   : > { %p1070_p1 = scmp.ne.s32.totalorder %s1321_s11, %s1069_s8  ;;  %s1073_s7 = sshll.u32 %s1174_s25, 4  ;;  %s1074_s7 = int_to_ptr.vmem [resolvable:$false] %s1073_s7 }
  0x56   : > { %s1075_s13 = scalar_lea.vmem %s1074_s7, 4096  ;;  %p1076_p4 = scmp.lt.s32.totalorder %s1321_s11, %s1074_s7 }
  0x57   : > { %p1071_p3 = pnand %p1070_p1, %p798_p5  ;;  %p1077_p8 = scmp.lt.s32.totalorder %s1075_s13, %s1069_s8 }
  0x59   : > { %p1072_p7 = pneg %p1071_p3  ;;  %p1078_p9 = por %p1077_p8, %p1076_p4 }
  0x5b   : > { %p1079_p0 = pnand %p1078_p9, %p1072_p7 }
  0x5d   : > { %1082 = shalt.err (!%p1079_p0)
}
  0x5e   : > { %s1175_s12 = smov 128   ;;  %s1176_s14 = smov 8  }
  0x5f   : > { %247 = dma.hbm_to_vmem [thread:$0]  (%p798_p5), %s1319_s10, %s1308_s22, %s1321_s11, %s1311_s24, %s1175_s12, %s1175_s12, %s1176_s14  }
  0x60 PF: > { %p1493_p11 = scmp.ne.s32.totalorder %s1490_s6, 0 }
  0x61   : > { %s1351_s21 = sand.u32 (!%p1493_p11), 1, %s1153_s16   ;;  %p1494_p2 = scmp.ne.s32.totalorder (!%p1493_p11), %s1487_s28, 0 }
  0x62   : > { %253 = sbr.rel (%p1493_p11) target bundleno = 402 (0x192), region = 36  ;;  %s803_s9 = sshll.u32 (!%p1493_p11), %s1351_s21, 7 }
  0x63   : > { %s256_s27 = scalar_lea.sflag (!%p1493_p11), [#allocation4], %s1351_s21  ;;  %s1357_s8 = scalar_lea.vmem (!%p1493_p11), [#allocation3], %s803_s9 }
  0x69   : > { %1136 = dma.done.wait (%p1494_p2), %s256_s27, 2048  }
  0x6a   : > { %1138 = vsyncadd (%p1494_p2), %s256_s27, 4294965248  ;;  %p1495_p5 = scmp.ne.s32.totalorder %s1486_s26, 0 }
  0x6c   : > { %1140 = dma.done.wait (%p1495_p5), [#allocation7], 2048  }
  0x6d   : > { %1142 = vsyncadd (%p1495_p5), [#allocation7], 4294965248  ;;  %v327_v0 = vld [vmem:[#allocation6] sm:$0xff]  ;;  %v328_v1 = vld [vmem:[#allocation6 + $0x8] sm:$0xff]  ;;  %s1391_s24 = scalar_lea.vmem [#allocation8], %s803_s9  ;;  %s642_s10 = scalar_lea.sflag [#allocation5], %s1351_s21 }
  0x6e   : > { %v329_v2 = vld [vmem:[#allocation6 + $0x10] sm:$0xff]  ;;  %v907_v3 = vpack.c.bf16 %v328_v1, %v327_v0  ;;  %v330_v4 = vld [vmem:[#allocation6 + $0x18] sm:$0xff]  ;;  %v331_v6 = vld [vmem:[#allocation6 + $0x20] sm:$0xff]  ;;  %p1496_p6 = scmp.ne.s32.totalorder %s1488_s29, 0 }
  0x6f   : > { %v911_v5 = vpack.c.bf16 %v330_v4, %v329_v2  ;;  %v332_v7 = vld [vmem:[#allocation6 + $0x28] sm:$0xff]  ;;  %v311_v9 = vld [vmem:[%s1357_s8] sm:$0xff]  ;;  %v333_v11 = vld [vmem:[#allocation6 + $0x30] sm:$0xff]  ;;  %s809_s11 = sshll.u32 (%p1496_p6), %s1161_s18, 4 }
  0x70   : > { %908 = vmatprep.subr.bf16.mxu0 %v907_v3  ;;  %939 = vmatprep.subr.bf16.mxu1 %v907_v3  ;;  %v915_v8 = vpack.c.bf16 %v332_v7, %v331_v6  ;;  %v319_v10 = vld [vmem:[%s1357_s8 + $0x40] sm:$0xff]  ;;  %v334_v12 = vld [vmem:[#allocation6 + $0x38] sm:$0xff]  ;;  %v336_v15 = vld [vmem:[#allocation6 + $0x48] sm:$0xff]  ;;  %s650_s25 = ssub.s32 (%p1496_p6), 38, %s809_s11 }
  0x71   : > { %910 = vmatpush3.bf16.msra.mxu0 %v907_v3  ;;  %947 = vmatpush3.bf16.msra.mxu1 %v907_v3  ;;  %v919_v13 = vpack.c.bf16 %v334_v12, %v333_v11  ;;  %v335_v14 = vld [vmem:[#allocation6 + $0x40] sm:$0xff]  ;;  %v337_v17 = vld [vmem:[#allocation6 + $0x50] sm:$0xff]  ;;  %v338_v18 = vld [vmem:[#allocation6 + $0x58] sm:$0xff]  ;;  %p651_p10 = scmp.lt.s32.totalorder (%p1496_p6), %s650_s25, 16 }
  0x72   : > { %912 = vmatprep.subr.bf16.mxu0 %v911_v5  ;;  %940 = vmatprep.subr.bf16.mxu1 %v911_v5  ;;  %v923_v16 = vpack.c.bf16 %v336_v15, %v335_v14  ;;  %v927_v19 = vpack.c.bf16 %v338_v18, %v337_v17  ;;  %v339_v20 = vld [vmem:[#allocation6 + $0x60] sm:$0xff]  ;;  %v340_v21 = vld [vmem:[#allocation6 + $0x68] sm:$0xff]  ;;  %v341_v23 = vld [vmem:[#allocation6 + $0x70] sm:$0xff] }
  0x73   : > { %883 = vmatprep.mubr.f32.mxu0 %v311_v9  ;;  %895 = vmatprep.mubr.f32.mxu1 %v319_v10  ;;  %v931_v22 = vpack.c.bf16 %v340_v21, %v339_v20  ;;  %v342_v24 = vld [vmem:[#allocation6 + $0x78] sm:$0xff]  ;;  %v312_v26 = vld [vmem:[%s1357_s8 + $0x8] sm:$0xff]  ;;  %v313_v28 = vld [vmem:[%s1357_s8 + $0x10] sm:$0xff] }
  0x74   : > { %v935_v25 = vpack.c.bf16 %v342_v24, %v341_v23  ;;  %v320_v27 = vld [vmem:[%s1357_s8 + $0x48] sm:$0xff]  ;;  %v321_v29 = vld [vmem:[%s1357_s8 + $0x50] sm:$0xff]  ;;  %v314_v30 = vld [vmem:[%s1357_s8 + $0x18] sm:$0xff] }
  0x75   : > { %914 = vmatpush3.bf16.msra.mxu0 %v911_v5  ;;  %948 = vmatpush3.bf16.msra.mxu1 %v911_v5  ;;  %v322_v31 = vld [vmem:[%s1357_s8 + $0x58] sm:$0xff]  ;;  %v315_v32 = vld [vmem:[%s1357_s8 + $0x20] sm:$0xff]  ;;  %v316_v34 = vld [vmem:[%s1357_s8 + $0x28] sm:$0xff] }
  0x76   : > { %916 = vmatprep.subr.bf16.mxu0 %v915_v8  ;;  %941 = vmatprep.subr.bf16.mxu1 %v915_v8  ;;  %v323_v33 = vld [vmem:[%s1357_s8 + $0x60] sm:$0xff]  ;;  %v324_v35 = vld [vmem:[%s1357_s8 + $0x68] sm:$0xff]  ;;  %v317_v36 = vld [vmem:[%s1357_s8 + $0x30] sm:$0xff] }
  0x77   : > { %v325_v37 = vld [vmem:[%s1357_s8 + $0x70] sm:$0xff]  ;;  %v318_v38 = vld [vmem:[%s1357_s8 + $0x38] sm:$0xff]  ;;  %v806_v40 = vld [vmem:[%s1478_s2] ss:$0 sm:$0xff] }
  0x78   : > { %v326_v39 = vld [vmem:[%s1357_s8 + $0x78] sm:$0xff]  ;;  %v807_v42 = vld [vmem:[%s1479_s3] ss:$0 sm:$0xff] }
  0x79   : > { %918 = vmatpush3.bf16.msra.mxu0 %v915_v8  ;;  %949 = vmatpush3.bf16.msra.mxu1 %v915_v8 }
  0x7a   : > { %920 = vmatprep.subr.bf16.mxu0 %v919_v13  ;;  %942 = vmatprep.subr.bf16.mxu1 %v919_v13 }
  0x7d   : > { %922 = vmatpush3.bf16.msra.mxu0 %v919_v13  ;;  %950 = vmatpush3.bf16.msra.mxu1 %v919_v13 }
  0x7e   : > { %924 = vmatprep.subr.bf16.mxu0 %v923_v16  ;;  %943 = vmatprep.subr.bf16.mxu1 %v923_v16 }
  0x81   : > { %926 = vmatpush3.bf16.msra.mxu0 %v923_v16  ;;  %951 = vmatpush3.bf16.msra.mxu1 %v923_v16 }
  0x82   : > { %928 = vmatprep.subr.bf16.mxu0 %v927_v19  ;;  %944 = vmatprep.subr.bf16.mxu1 %v927_v19 }
  0x85   : > { %930 = vmatpush3.bf16.msra.mxu0 %v927_v19  ;;  %952 = vmatpush3.bf16.msra.mxu1 %v927_v19 }
  0x86   : > { %932 = vmatprep.subr.bf16.mxu0 %v931_v22  ;;  %945 = vmatprep.subr.bf16.mxu1 %v931_v22 }
  0x89   : > { %934 = vmatpush3.bf16.msra.mxu0 %v931_v22  ;;  %953 = vmatpush3.bf16.msra.mxu1 %v931_v22 }
  0x8a   : > { %936 = vmatprep.subr.bf16.mxu0 %v935_v25  ;;  %946 = vmatprep.subr.bf16.mxu1 %v935_v25 }
  0x8d   : > { %938 = vmatpush3.bf16.msra.mxu0 %v935_v25  ;;  %954 = vmatpush3.bf16.msra.mxu1 %v935_v25 }
  0x90   : > { %884 = vmatmul.mubr.f32.vlgmr.msra.gmra.mrb[0].mxu0 %v312_v26  ;;  %896 = vmatmul.mubr.f32.vlgmr.msra.gmra.mrb[0].mxu1 %v320_v27 }
  0x91   : > { %886 = vmatprep.mubr.f32.mxu0 %v313_v28  ;;  %898 = vmatprep.mubr.f32.mxu1 %v321_v29 }
  0x94   : > { %887 = vmatmul.mubr.f32.gmra.mrb[2].mxu0 %v314_v30  ;;  %899 = vmatmul.mubr.f32.gmra.mrb[2].mxu1 %v322_v31 }
  0x95   : > { %889 = vmatprep.mubr.f32.mxu0 %v315_v32  ;;  %901 = vmatprep.mubr.f32.mxu1 %v323_v33 }
  0x98   : > { %890 = vmatmul.mubr.f32.gmra.mrb[4].mxu0 %v316_v34  ;;  %902 = vmatmul.mubr.f32.gmra.mrb[4].mxu1 %v324_v35 }
  0x99   : > { %892 = vmatprep.mubr.f32.mxu0 %v317_v36  ;;  %904 = vmatprep.mubr.f32.mxu1 %v325_v37 }
  0x9c   : > { %893 = vmatmul.mubr.f32.gmra.mrb[6].mxu0 %v318_v38  ;;  %905 = vmatmul.mubr.f32.gmra.mrb[6].mxu1 %v326_v39 }
 0x163   : > { %v885_v41 = vpop.f32.mrb[0].mxu0  ;;  %v897_v43 = vpop.f32.mrb[0].mxu1 }
 0x164   : > { %v587_v44 = vmul.f32 %v885_v41, %v806_v40  ;;  %v595_v45 = vmul.f32 %v897_v43, %v806_v40  ;;  %v409_v46 = vpop.f32.mrb[1].mxu0  ;;  %v449_v47 = vpop.f32.mrb[1].mxu1 }
 0x165   : > { %v586_v48 = vmul.f32 %v806_v40, %v409_v46  ;;  %v594_v49 = vmul.f32 %v806_v40, %v449_v47 }
 0x166   : > { %v610_v50 = vadd.f32 %v807_v42, %v587_v44  ;;  %v618_v51 = vadd.f32 %v807_v42, %v595_v45 }
 0x167   : > { %v609_v52 = vadd.f32 %v807_v42, %v586_v48  ;;  %v617_v53 = vadd.f32 %v807_v42, %v594_v49  ;;  %v888_v54 = vpop.f32.mrb[2].mxu0  ;;  %v900_v55 = vpop.f32.mrb[2].mxu1 }
 0x168   : > { %626 = vst [vmem:[%s1391_s24 + $0x8] sm:$0xff] %v610_v50  ;;  %634 = vst [vmem:[%s1391_s24 + $0x48] sm:$0xff] %v618_v51  ;;  %v589_v56 = vmul.f32 %v888_v54, %v806_v40  ;;  %v597_v57 = vmul.f32 %v900_v55, %v806_v40  ;;  %v419_v58 = vpop.f32.mrb[3].mxu0  ;;  %v459_v59 = vpop.f32.mrb[3].mxu1 }
 0x169   : > { %625 = vst [vmem:[%s1391_s24] sm:$0xff] %v609_v52  ;;  %633 = vst [vmem:[%s1391_s24 + $0x40] sm:$0xff] %v617_v53  ;;  %v588_v60 = vmul.f32 %v806_v40, %v419_v58  ;;  %v596_v61 = vmul.f32 %v806_v40, %v459_v59 }
 0x16a   : > { %v612_v62 = vadd.f32 %v807_v42, %v589_v56  ;;  %v620_v63 = vadd.f32 %v807_v42, %v597_v57 }
 0x16b   : > { %v611_v0 = vadd.f32 %v807_v42, %v588_v60  ;;  %v619_v1 = vadd.f32 %v807_v42, %v596_v61  ;;  %v891_v2 = vpop.f32.mrb[4].mxu0  ;;  %v903_v3 = vpop.f32.mrb[4].mxu1 }
 0x16c   : > { %628 = vst [vmem:[%s1391_s24 + $0x18] sm:$0xff] %v612_v62  ;;  %636 = vst [vmem:[%s1391_s24 + $0x58] sm:$0xff] %v620_v63  ;;  %v591_v4 = vmul.f32 %v891_v2, %v806_v40  ;;  %v599_v5 = vmul.f32 %v903_v3, %v806_v40  ;;  %v429_v6 = vpop.f32.mrb[5].mxu0  ;;  %v469_v7 = vpop.f32.mrb[5].mxu1 }
 0x16d   : > { %627 = vst [vmem:[%s1391_s24 + $0x10] sm:$0xff] %v611_v0  ;;  %635 = vst [vmem:[%s1391_s24 + $0x50] sm:$0xff] %v619_v1  ;;  %v590_v8 = vmul.f32 %v806_v40, %v429_v6  ;;  %v598_v9 = vmul.f32 %v806_v40, %v469_v7 }
 0x16e   : > { %v614_v10 = vadd.f32 %v807_v42, %v591_v4  ;;  %v622_v11 = vadd.f32 %v807_v42, %v599_v5 }
 0x16f   : > { %v613_v12 = vadd.f32 %v807_v42, %v590_v8  ;;  %v621_v13 = vadd.f32 %v807_v42, %v598_v9  ;;  %v894_v14 = vpop.f32.mrb[6].mxu0  ;;  %v906_v15 = vpop.f32.mrb[6].mxu1  ;;  %648 = sbr.rel (!%p1496_p6) target bundleno = 402 (0x192), region = 60 }
 0x170   : > { %630 = vst [vmem:[%s1391_s24 + $0x28] sm:$0xff] %v614_v10  ;;  %638 = vst [vmem:[%s1391_s24 + $0x68] sm:$0xff] %v622_v11  ;;  %v593_v16 = vmul.f32 %v894_v14, %v806_v40  ;;  %v601_v17 = vmul.f32 %v906_v15, %v806_v40  ;;  %v439_v18 = vpop.f32.mrb[7].mxu0  ;;  %v479_v19 = vpop.f32.mrb[7].mxu1 }
 0x171   : > { %629 = vst [vmem:[%s1391_s24 + $0x20] sm:$0xff] %v613_v12  ;;  %637 = vst [vmem:[%s1391_s24 + $0x60] sm:$0xff] %v621_v13  ;;  %v592_v20 = vmul.f32 %v806_v40, %v439_v18  ;;  %v600_v21 = vmul.f32 %v806_v40, %v479_v19 }
 0x172   : > { %v616_v22 = vadd.f32 %v807_v42, %v593_v16  ;;  %v624_v23 = vadd.f32 %v807_v42, %v601_v17 }
 0x173   : > { %v615_v24 = vadd.f32 %v807_v42, %v592_v20  ;;  %v623_v25 = vadd.f32 %v807_v42, %v600_v21 }
 0x174   : > { %632 = vst [vmem:[%s1391_s24 + $0x38] sm:$0xff] %v616_v22  ;;  %640 = vst [vmem:[%s1391_s24 + $0x78] sm:$0xff] %v624_v23 }
 0x175   : > { %631 = vst [vmem:[%s1391_s24 + $0x30] sm:$0xff] %v615_v24  ;;  %639 = vst [vmem:[%s1391_s24 + $0x70] sm:$0xff] %v623_v25 }
 0x176   : > { %s1508_s25 = smov (!%p651_p10, %s650_s25), 16 }
 0x177   : > { %s1413_s7 = sshll.u32 %s1508_s25, 7 }
 0x178   : > { %s655_s13 = ssub.s32 2048, %s1413_s7 }
 0x179   : > { %656 = vsyncadd %s642_s10, %s655_s13  ;;  %p811_p12 = scmp.ne.s32.totalorder %s1413_s7, 0  ;;  %s818_s29 = sshll.u32 %s1161_s18, 11 }
 0x17a   : > { %s1423_s9 = scalar_lea.hbm %s1480_s4, %s818_s29  ;;  %s662_s27 = sshll.u32 %s1391_s24, 4  ;;  %s1426_s27 = int_to_ptr.vmem [resolvable:$true] %s662_s27 }
 0x17b   : > { %s1083_s8 = scalar_lea.vmem %s1426_s27, %s1413_s7  ;;  %s1177_s26 = smov [#allocation8]  }
 0x17c   : > { %p1084_p13 = scmp.ne.s32.totalorder %s1426_s27, %s1083_s8  ;;  %s1087_s28 = sshll.u32 %s1177_s26, 4  ;;  %s1088_s28 = int_to_ptr.vmem [resolvable:$false] %s1087_s28 }
 0x17d   : > { %s1089_s18 = scalar_lea.vmem %s1088_s28, 4096  ;;  %p1090_p7 = scmp.lt.s32.totalorder %s1426_s27, %s1088_s28 }
 0x17e   : > { %p1085_p1 = pnand %p1084_p13, %p811_p12  ;;  %p1091_p4 = scmp.lt.s32.totalorder %s1089_s18, %s1083_s8 }
 0x180   : > { %p1086_p3 = pneg %p1085_p1  ;;  %p1092_p8 = por %p1091_p4, %p1090_p7 }
 0x182   : > { %p1093_p9 = pnand %p1092_p8, %p1086_p3 }
 0x184   : > { %1096 = shalt.err (!%p1093_p9)
}
 0x185   : > { %s1097_s6 = scalar_lea.hbm %s1423_s9, %s1413_s7  ;;  %s1101_s11 = scalar_lea.hbm %s1480_s4, 4864 }
 0x186   : > { %p1098_p0 = scmp.ne.s32.totalorder %s1423_s9, %s1097_s6  ;;  %p1102_p5 = scmp.lt.u32.totalorder %s1423_s9, %s1480_s4 }
 0x187   : > { %p1103_p6 = scmp.lt.u32.totalorder %s1101_s11, %s1097_s6  ;;  %p1105_p13 = scmp.lt.u32.totalorder %s1097_s6, %s1423_s9 }
 0x188   : > { %p1099_p11 = pnand %p1098_p0, %p811_p12 }
 0x189   : > { %p1104_p10 = por %p1103_p6, %p1102_p5 }
 0x18a   : > { %p1100_p2 = pneg %p1099_p11 }
 0x18b   : > { %p1106_p1 = por %p1105_p13, %p1104_p10 }
 0x18d   : > { %p1107_p3 = pnand %p1106_p1, %p1100_p2 }
 0x18f   : > { %1110 = shalt.err (!%p1107_p3)
}
 0x190   : > { %s1178_s29 = smov 128   ;;  %s1179_s12 = smov 8  }
 0x191   : > { %668 = dma.vmem_to_hbm [thread:$0]  (%p811_p12), %s1426_s27, %s1413_s7, %s1423_s9, %s642_s10, %s1178_s29, %s1178_s29, %s1179_s12  }
 0x192 PF: > { %p971_p7 = scmp.ge.s32.totalorder %s1169_s20, 2  ;;  %s677_s14 = sand.u32 1, %s1149_s15  }
 0x193   : > { %p1497_p4 = scmp.ne.s32.totalorder %s1489_s5, 0  ;;  %s678_s8 = scalar_lea.sflag [#allocation5], %s677_s14 }
 0x195   : > { %p966_p8 = pnand %p971_p7, %p1497_p4 }
 0x197   : > { %1144 = dma.done.wait (!%p966_p8), %s678_s8, 2048  }
 0x198   : > { %1146 = vsyncadd (!%p966_p8), %s678_s8, 4294965248  ;;  %s21_s20 = sadd.s32 1, %s1169_s20   ;;  %s1498_s15 = smov %s1153_s16 }
 0x199   : > { %p18_p9 = scmp.ge.s32.totalorder %s21_s20, 5   ;;  %s1499_s16 = smov %s1157_s17 }
 0x19a   : > { %s1500_s17 = smov %s1267_s30  ;;  %s1501_s18 = smov %s1165_s19 }
 0x19b   : > { %s1502_s19 = smov %s1504_s23  ;;  %20 = sbr.rel (!%p18_p9) target bundleno = 7 (0x7), region = 104 }
 0x1a2   :  { %683 = vsyncpa [#allocation4], 1 }
 0x1a3   :  { %685 = vsyncpa [#allocation4 + $0x1], 1 }
 0x1a4   :  { %686 = vsyncpa [#allocation7], 1 }
 0x1a5   :  { %687 = vsyncpa [#allocation5], 1 }
 0x1a6   :  { %689 = vsyncpa [#allocation5 + $0x1], 1 }

</bundles_post_ra>
